<compile_context>
chip_gen: v5e
topology: v5e:2x2
jax: 0.10.0
libtpu: 0.0.40
codegen_flags: <defaults>
</compile_context>

<pallas_src>
import functools

import jax
import jax.numpy as jnp
from jax.experimental import pallas as pl
from jax.experimental.pallas import tpu as pltpu

HIDDEN = 256
LANE = 128
TB_MAX = 1024


def _cdiv(a, b):
    return -(-a // b)


def _round_up(x, m):
    return ((x + m - 1) // m) * m


# --------------------------------------------------------------------------- kernel
def twinq_kernel(obs_ref, act_ref, w1_ref, b1_ref, w2a_ref, w2b_ref, b2_ref,
                 w3a_ref, w3b_ref, b3_ref, out_ref, x_ref, *, obs_dim, act_dim):
    in_dim = obs_dim + act_dim

    # Assemble the zero-padded layer-1 input in VMEM (no wrapper-side HBM pad/concat pass).
    # Padding lanes must be zero every step (scratch persists but may hold garbage on a core
    # whose first grid step is not 0), so clear the whole tile; it is a trivial VPU fill.
    x_ref[...] = jnp.zeros_like(x_ref)
    x_ref[:, :obs_dim] = obs_ref[...]
    x_ref[:, obs_dim:in_dim] = act_ref[...]
    x = x_ref[...].astype(jnp.bfloat16)

    # Layer 1: both heads fused on the output axis -> one [TB,128]x[128,512] bf16 MXU matmul.
    h1 = jnp.dot(x, w1_ref[...], preferred_element_type=jnp.float32) + b1_ref[...]
    h1 = jnp.maximum(h1, 0.0).astype(jnp.bfloat16)

    # Layer 2: two independent [TB,256]x[256,256] matmuls (no block-diagonal zero work).
    h1a = h1[:, :HIDDEN]
    h1b = h1[:, HIDDEN:]
    h2a = jnp.dot(h1a, w2a_ref[...], preferred_element_type=jnp.float32) + b2_ref[:, :HIDDEN]
    h2b = jnp.dot(h1b, w2b_ref[...], preferred_element_type=jnp.float32) + b2_ref[:, HIDDEN:]
    h2a = jnp.maximum(h2a, 0.0).astype(jnp.bfloat16)
    h2b = jnp.maximum(h2b, 0.0).astype(jnp.bfloat16)

    # Layer 3: lane-padded heads (q1 -> lane 0, q2 -> lane 1) -> lane-dense bf16 store.
    q = (jnp.dot(h2a, w3a_ref[...], preferred_element_type=jnp.float32)
         + jnp.dot(h2b, w3b_ref[...], preferred_element_type=jnp.float32)
         + b3_ref[...])
    out_ref[...] = q.astype(out_ref.dtype)


# --------------------------------------------------------------------------- wrapper
def _tiles_for_batch(B):
    """Batch tile size + number of grid steps.

    - tiny batches: one 8-row tile (latency path, weight DMA dominates anyway)
    - otherwise: >=2 grid steps (so v7x's two TensorCores both get work), each tile
      <= TB_MAX rows, and tile = round_up(cdiv(B, n_tiles), 8) to avoid overshoot.
    """
    if B <= 8:
        return _round_up(max(B, 1), 8), 1
    n_tiles = max(2, _cdiv(B, TB_MAX))
    tb = _round_up(_cdiv(B, n_tiles), 8)
    return tb, n_tiles


def twinq_forward(obs, action, packed):
    """Fused twin-Q forward. obs: [B, obs_dim], action: [B, action_dim] -> (q1, q2), each [B, 1] f32."""
    w1, b1, w2a, w2b, b2, w3a, w3b, b3 = packed
    B, obs_dim = obs.shape
    act_dim = action.shape[1]
    k_pad = w1.shape[0]

    tb, n_tiles = _tiles_for_batch(B)
    b_pad = tb * n_tiles
    if b_pad != B:
        obs = jnp.pad(obs, ((0, b_pad - B), (0, 0)))
        action = jnp.pad(action, ((0, b_pad - B), (0, 0)))

    kernel = functools.partial(twinq_kernel, obs_dim=obs_dim, act_dim=act_dim)

    out = pl.pallas_call(
        kernel,
        out_shape=jax.ShapeDtypeStruct((b_pad, LANE), jnp.bfloat16),
        grid=(n_tiles,),
        in_specs=[
            pl.BlockSpec((tb, obs_dim), lambda i: (i, 0)),             # obs: tiled over batch
            pl.BlockSpec((tb, act_dim), lambda i: (i, 0)),             # action: tiled over batch
            pl.BlockSpec((k_pad, 2 * HIDDEN), lambda i: (0, 0)),        # w1 (fused heads)
            pl.BlockSpec((1, 2 * HIDDEN), lambda i: (0, 0)),            # b1
            pl.BlockSpec((HIDDEN, HIDDEN), lambda i: (0, 0)),           # w2 head 1
            pl.BlockSpec((HIDDEN, HIDDEN), lambda i: (0, 0)),           # w2 head 2
            pl.BlockSpec((1, 2 * HIDDEN), lambda i: (0, 0)),            # b2
            pl.BlockSpec((HIDDEN, LANE), lambda i: (0, 0)),             # w3 head 1 (lane 0)
            pl.BlockSpec((HIDDEN, LANE), lambda i: (0, 0)),             # w3 head 2 (lane 1)
            pl.BlockSpec((1, LANE), lambda i: (0, 0)),                  # b3
        ],
        out_specs=pl.BlockSpec((tb, LANE), lambda i: (i, 0)),
        scratch_shapes=[pltpu.VMEM((tb, k_pad), jnp.float32)],          # padded layer-1 input
        compiler_params=pltpu.CompilerParams(
            dimension_semantics=("parallel",)),                         # 2 TCs on v7x
    )(obs, action, w1, b1, w2a, w2b, b2, w3a, w3b, b3)

    q1 = out[:B, 0:1].astype(jnp.float32)
    q2 = out[:B, 1:2].astype(jnp.float32)
    return q1, q2


# --------------------------------------------------------------------------- params
def init_twinq_params(key, obs_dim, action_dim):
    """Per-net params (stored as [in, out]) with PyTorch nn.Linear default init."""
    in_dim = obs_dim + action_dim
    ks = jax.random.split(key, 12)

    def lin(kw, kb, fan_in, fan_out):
        bound = 1.0 / (fan_in ** 0.5)
        w = jax.random.uniform(kw, (fan_in, fan_out), jnp.float32, -bound, bound)
        b = jax.random.uniform(kb, (fan_out,), jnp.float32, -bound, bound)
        return w, b

    net1 = (lin(ks[0], ks[1], in_dim, HIDDEN),
            lin(ks[2], ks[3], HIDDEN, HIDDEN),
            lin(ks[4], ks[5], HIDDEN, 1))
    net2 = (lin(ks[6], ks[7], in_dim, HIDDEN),
            lin(ks[8], ks[9], HIDDEN, HIDDEN),
            lin(ks[10], ks[11], HIDDEN, 1))
    return net1, net2


def pack_twinq_params(net1, net2, obs_dim, action_dim):
    """Fuse the two Q heads into lane-aligned, MXU-friendly bf16 weights (f32 biases)."""
    in_dim = obs_dim + action_dim
    k_pad = _round_up(in_dim, LANE)
    (w1a, b1a), (w2a, b2a), (w3a, b3a) = net1
    (w1b, b1b), (w2b, b2b), (w3b, b3b) = net2

    # Layer 1: concat heads on the output axis, zero-pad K rows to a full 128-lane tile.
    w1 = jnp.zeros((k_pad, 2 * HIDDEN), jnp.float32)
    w1 = w1.at[:in_dim, :HIDDEN].set(w1a).at[:in_dim, HIDDEN:].set(w1b)
    b1 = jnp.concatenate([b1a, b1b])[None, :]

    # Layer 2: the two heads stay as independent [256, 256] weights (no block-diag zeros).
    b2 = jnp.concatenate([b2a, b2b])[None, :]

    # Layer 3: lane-pad each scalar head to 128 output lanes (q1 -> lane 0, q2 -> lane 1).
    w3a_p = jnp.zeros((HIDDEN, LANE), jnp.float32).at[:, 0:1].set(w3a)
    w3b_p = jnp.zeros((HIDDEN, LANE), jnp.float32).at[:, 1:2].set(w3b)
    b3 = jnp.zeros((1, LANE), jnp.float32).at[0, 0].set(b3a[0]).at[0, 1].set(b3b[0])

    return (w1.astype(jnp.bfloat16), b1,
            w2a.astype(jnp.bfloat16), w2b.astype(jnp.bfloat16), b2,
            w3a_p.astype(jnp.bfloat16), w3b_p.astype(jnp.bfloat16), b3)


def twinq_reference(obs, action, packed):
    """Same math in plain JAX (bf16 weights, f32 accumulation, bf16 output) for checking."""
    w1, b1, w2a, w2b, b2, w3a, w3b, b3 = packed
    k_pad = w1.shape[0]
    x = jnp.concatenate([obs, action], axis=-1)
    x = jnp.pad(x, ((0, 0), (0, k_pad - x.shape[-1]))).astype(jnp.bfloat16)
    h1 = jnp.maximum(jnp.dot(x, w1, preferred_element_type=jnp.float32) + b1, 0.0).astype(jnp.bfloat16)
    h2a = jnp.maximum(jnp.dot(h1[:, :HIDDEN], w2a, preferred_element_type=jnp.float32)
                      + b2[:, :HIDDEN], 0.0).astype(jnp.bfloat16)
    h2b = jnp.maximum(jnp.dot(h1[:, HIDDEN:], w2b, preferred_element_type=jnp.float32)
                      + b2[:, HIDDEN:], 0.0).astype(jnp.bfloat16)
    q = (jnp.dot(h2a, w3a, preferred_element_type=jnp.float32)
         + jnp.dot(h2b, w3b, preferred_element_type=jnp.float32) + b3).astype(jnp.bfloat16)
    return q[:, 0:1].astype(jnp.float32), q[:, 1:2].astype(jnp.float32)


if __name__ == "__main__":
    key = jax.random.PRNGKey(0)
    k_obs, k_act, k_params = jax.random.split(key, 3)

    batch = 2
    obs_dim = 32
    action_dim = 8

    obs = jax.random.normal(k_obs, (batch, obs_dim), jnp.float32)
    action = jax.random.normal(k_act, (batch, action_dim), jnp.float32)

    net1, net2 = init_twinq_params(k_params, obs_dim, action_dim)
    packed = pack_twinq_params(net1, net2, obs_dim, action_dim)

    q1, q2 = twinq_forward(obs, action, packed)
    q1, q2 = jax.block_until_ready((q1, q2))

    r1, r2 = twinq_reference(obs, action, packed)

    assert q1.shape == (batch, 1) and q2.shape == (batch, 1)
    assert jnp.allclose(q1, r1, atol=1e-2, rtol=1e-2)
    assert jnp.allclose(q2, r2, atol=1e-2, rtol=1e-2)

    # NOTE: bf16 weights/activations give ~1e-2 relative error vs a bit-exact f32 PyTorch module.
    print("KERNEL_OK")
</pallas_src>

<mosaic_0001>
module attributes {stable_mosaic.version = 11 : i64} {
  func.func @twinq_kernel(%arg0: i32, %arg1: memref<8x32xf32, #tpu.memory_space<vmem>>, %arg2: memref<8x8xf32, #tpu.memory_space<vmem>>, %arg3: memref<128x512xbf16, #tpu.memory_space<vmem>>, %arg4: memref<1x512xf32, #tpu.memory_space<vmem>>, %arg5: memref<256x256xbf16, #tpu.memory_space<vmem>>, %arg6: memref<256x256xbf16, #tpu.memory_space<vmem>>, %arg7: memref<1x512xf32, #tpu.memory_space<vmem>>, %arg8: memref<256x128xbf16, #tpu.memory_space<vmem>>, %arg9: memref<256x128xbf16, #tpu.memory_space<vmem>>, %arg10: memref<1x128xf32, #tpu.memory_space<vmem>>, %arg11: memref<8x128xbf16, #tpu.memory_space<vmem>>, %arg12: memref<8x128xf32, #tpu.memory_space<vmem>>) attributes {dimension_semantics = [#tpu.dimension_semantics<parallel>], iteration_bounds = array<i64: 1>, scalar_prefetch = 0 : i64, scratch_operands = 1 : i64, tpu.core_type = #tpu.core_type<tc>, window_params = [{transform_indices = @transform_0, window_bounds = array<i64: 8, 32>}, {transform_indices = @transform_1, window_bounds = array<i64: 8, 8>}, {pipeline_mode = #tpu.pipeline_mode<synchronous>, transform_indices = @transform_2, window_bounds = array<i64: 128, 512>}, {pipeline_mode = #tpu.pipeline_mode<synchronous>, transform_indices = @transform_3, window_bounds = array<i64: 1, 512>}, {pipeline_mode = #tpu.pipeline_mode<synchronous>, transform_indices = @transform_4, window_bounds = array<i64: 256, 256>}, {pipeline_mode = #tpu.pipeline_mode<synchronous>, transform_indices = @transform_5, window_bounds = array<i64: 256, 256>}, {pipeline_mode = #tpu.pipeline_mode<synchronous>, transform_indices = @transform_6, window_bounds = array<i64: 1, 512>}, {pipeline_mode = #tpu.pipeline_mode<synchronous>, transform_indices = @transform_7, window_bounds = array<i64: 256, 128>}, {pipeline_mode = #tpu.pipeline_mode<synchronous>, transform_indices = @transform_8, window_bounds = array<i64: 256, 128>}, {pipeline_mode = #tpu.pipeline_mode<synchronous>, transform_indices = @transform_9, window_bounds = array<i64: 1, 128>}, {transform_indices = @transform_10, window_bounds = array<i64: 8, 128>}]} {
    %cst = arith.constant 0.000000e+00 : f32
    %0 = vector.broadcast %cst : f32 to vector<8x128xf32>
    %c0 = arith.constant 0 : index
    %c0_0 = arith.constant 0 : index
    %1 = vector.load %arg12[%c0, %c0_0] : memref<8x128xf32, #tpu.memory_space<vmem>>, vector<8x128xf32>
    tpu.vector_store %arg12[%c0, %c0_0], %0 {strides = array<i32>} : memref<8x128xf32, #tpu.memory_space<vmem>>, vector<8x128xf32>,
    %c0_1 = arith.constant 0 : index
    %c0_2 = arith.constant 0 : index
    %2 = vector.load %arg1[%c0_1, %c0_2] : memref<8x32xf32, #tpu.memory_space<vmem>>, vector<8x32xf32>
    %c0_3 = arith.constant 0 : index
    %c0_4 = arith.constant 0 : index
    %3 = vector.load %arg12[%c0_3, %c0_4] : memref<8x128xf32, #tpu.memory_space<vmem>>, vector<8x32xf32>
    tpu.vector_store %arg12[%c0_3, %c0_4], %2 {strides = array<i32>} : memref<8x128xf32, #tpu.memory_space<vmem>>, vector<8x32xf32>,
    %c0_5 = arith.constant 0 : index
    %c0_6 = arith.constant 0 : index
    %4 = vector.load %arg2[%c0_5, %c0_6] : memref<8x8xf32, #tpu.memory_space<vmem>>, vector<8x8xf32>
    %c0_7 = arith.constant 0 : index
    %c32 = arith.constant 32 : index
    %5 = vector.load %arg12[%c0_7, %c32] : memref<8x128xf32, #tpu.memory_space<vmem>>, vector<8x8xf32>
    tpu.vector_store %arg12[%c0_7, %c32], %4 {strides = array<i32>} : memref<8x128xf32, #tpu.memory_space<vmem>>, vector<8x8xf32>,
    %c0_8 = arith.constant 0 : index
    %c0_9 = arith.constant 0 : index
    %6 = vector.load %arg12[%c0_8, %c0_9] : memref<8x128xf32, #tpu.memory_space<vmem>>, vector<8x128xf32>
    %7 = arith.truncf %6 : vector<8x128xf32> to vector<8x128xbf16>
    %c0_10 = arith.constant 0 : index
    %c0_11 = arith.constant 0 : index
    %8 = vector.load %arg3[%c0_10, %c0_11] : memref<128x512xbf16, #tpu.memory_space<vmem>>, vector<128x512xbf16>
    %cst_12 = arith.constant dense<0.000000e+00> : vector<8x512xf32>
    %9 = tpu.matmul %7, %8, %cst_12 {dimension_numbers = #tpu.dot_dimension_numbers<[1], [0], [0], [1], [0, 0, 1, 1], [], []>} : vector<8x128xbf16>, vector<128x512xbf16>, vector<8x512xf32> -> vector<8x512xf32>
    %c0_13 = arith.constant 0 : index
    %c0_14 = arith.constant 0 : index
    %10 = vector.load %arg4[%c0_13, %c0_14] : memref<1x512xf32, #tpu.memory_space<vmem>>, vector<1x512xf32>
    %11 = vector.broadcast %10 : vector<1x512xf32> to vector<8x512xf32>
    %12 = arith.addf %9, %11 : vector<8x512xf32>
    %cst_15 = arith.constant 0.000000e+00 : f32
    %13 = vector.broadcast %cst_15 : f32 to vector<8x512xf32>
    %14 = arith.maximumf %12, %13 : vector<8x512xf32>
    %15 = arith.truncf %14 : vector<8x512xf32> to vector<8x512xbf16>
    %16 = vector.extract_strided_slice %15 {offsets = [0, 0], sizes = [8, 256], strides = [1, 1]} : vector<8x512xbf16> to vector<8x256xbf16>
    %17 = vector.extract_strided_slice %15 {offsets = [0, 256], sizes = [8, 256], strides = [1, 1]} : vector<8x512xbf16> to vector<8x256xbf16>
    %c0_16 = arith.constant 0 : index
    %c0_17 = arith.constant 0 : index
    %18 = vector.load %arg5[%c0_16, %c0_17] : memref<256x256xbf16, #tpu.memory_space<vmem>>, vector<256x256xbf16>
    %cst_18 = arith.constant dense<0.000000e+00> : vector<8x256xf32>
    %19 = tpu.matmul %16, %18, %cst_18 {dimension_numbers = #tpu.dot_dimension_numbers<[1], [0], [0], [1], [0, 0, 1, 1], [], []>} : vector<8x256xbf16>, vector<256x256xbf16>, vector<8x256xf32> -> vector<8x256xf32>
    %c0_19 = arith.constant 0 : index
    %c0_20 = arith.constant 0 : index
    %20 = vector.load %arg7[%c0_19, %c0_20] : memref<1x512xf32, #tpu.memory_space<vmem>>, vector<1x256xf32>
    %21 = vector.broadcast %20 : vector<1x256xf32> to vector<8x256xf32>
    %22 = arith.addf %19, %21 : vector<8x256xf32>
    %c0_21 = arith.constant 0 : index
    %c0_22 = arith.constant 0 : index
    %23 = vector.load %arg6[%c0_21, %c0_22] : memref<256x256xbf16, #tpu.memory_space<vmem>>, vector<256x256xbf16>
    %cst_23 = arith.constant dense<0.000000e+00> : vector<8x256xf32>
    %24 = tpu.matmul %17, %23, %cst_23 {dimension_numbers = #tpu.dot_dimension_numbers<[1], [0], [0], [1], [0, 0, 1, 1], [], []>} : vector<8x256xbf16>, vector<256x256xbf16>, vector<8x256xf32> -> vector<8x256xf32>
    %c0_24 = arith.constant 0 : index
    %c256 = arith.constant 256 : index
    %25 = vector.load %arg7[%c0_24, %c256] : memref<1x512xf32, #tpu.memory_space<vmem>>, vector<1x256xf32>
    %26 = vector.broadcast %25 : vector<1x256xf32> to vector<8x256xf32>
    %27 = arith.addf %24, %26 : vector<8x256xf32>
    %cst_25 = arith.constant 0.000000e+00 : f32
    %28 = vector.broadcast %cst_25 : f32 to vector<8x256xf32>
    %29 = arith.maximumf %22, %28 : vector<8x256xf32>
    %30 = arith.truncf %29 : vector<8x256xf32> to vector<8x256xbf16>
    %cst_26 = arith.constant 0.000000e+00 : f32
    %31 = vector.broadcast %cst_26 : f32 to vector<8x256xf32>
    %32 = arith.maximumf %27, %31 : vector<8x256xf32>
    %33 = arith.truncf %32 : vector<8x256xf32> to vector<8x256xbf16>
    %c0_27 = arith.constant 0 : index
    %c0_28 = arith.constant 0 : index
    %34 = vector.load %arg8[%c0_27, %c0_28] : memref<256x128xbf16, #tpu.memory_space<vmem>>, vector<256x128xbf16>
    %cst_29 = arith.constant dense<0.000000e+00> : vector<8x128xf32>
    %35 = tpu.matmul %30, %34, %cst_29 {dimension_numbers = #tpu.dot_dimension_numbers<[1], [0], [0], [1], [0, 0, 1, 1], [], []>} : vector<8x256xbf16>, vector<256x128xbf16>, vector<8x128xf32> -> vector<8x128xf32>
    %c0_30 = arith.constant 0 : index
    %c0_31 = arith.constant 0 : index
    %36 = vector.load %arg9[%c0_30, %c0_31] : memref<256x128xbf16, #tpu.memory_space<vmem>>, vector<256x128xbf16>
    %cst_32 = arith.constant dense<0.000000e+00> : vector<8x128xf32>
    %37 = tpu.matmul %33, %36, %cst_32 {dimension_numbers = #tpu.dot_dimension_numbers<[1], [0], [0], [1], [0, 0, 1, 1], [], []>} : vector<8x256xbf16>, vector<256x128xbf16>, vector<8x128xf32> -> vector<8x128xf32>
    %38 = arith.addf %35, %37 : vector<8x128xf32>
    %c0_33 = arith.constant 0 : index
    %c0_34 = arith.constant 0 : index
    %39 = vector.load %arg10[%c0_33, %c0_34] : memref<1x128xf32, #tpu.memory_space<vmem>>, vector<1x128xf32>
    %40 = vector.broadcast %39 : vector<1x128xf32> to vector<8x128xf32>
    %41 = arith.addf %38, %40 : vector<8x128xf32>
    %42 = arith.truncf %41 : vector<8x128xf32> to vector<8x128xbf16>
    %c0_35 = arith.constant 0 : index
    %c0_36 = arith.constant 0 : index
    %43 = vector.load %arg11[%c0_35, %c0_36] : memref<8x128xbf16, #tpu.memory_space<vmem>>, vector<8x128xbf16>
    tpu.vector_store %arg11[%c0_35, %c0_36], %42 {strides = array<i32>} : memref<8x128xbf16, #tpu.memory_space<vmem>>, vector<8x128xbf16>,
    return
  }
  func.func @transform_0(%arg0: i32) -> (i32, i32) {
    %c0_i32 = arith.constant 0 : i32
    %c0_i32_0 = arith.constant 0 : i32
    return %arg0, %c0_i32 : i32, i32
  }
  func.func @transform_1(%arg0: i32) -> (i32, i32) {
    %c0_i32 = arith.constant 0 : i32
    %c0_i32_0 = arith.constant 0 : i32
    return %arg0, %c0_i32 : i32, i32
  }
  func.func @transform_2(%arg0: i32) -> (i32, i32) {
    %c0_i32 = arith.constant 0 : i32
    %c0_i32_0 = arith.constant 0 : i32
    %c0_i32_1 = arith.constant 0 : i32
    return %c0_i32, %c0_i32_0 : i32, i32
  }
  func.func @transform_3(%arg0: i32) -> (i32, i32) {
    %c0_i32 = arith.constant 0 : i32
    %c0_i32_0 = arith.constant 0 : i32
    %c0_i32_1 = arith.constant 0 : i32
    return %c0_i32, %c0_i32_0 : i32, i32
  }
  func.func @transform_4(%arg0: i32) -> (i32, i32) {
    %c0_i32 = arith.constant 0 : i32
    %c0_i32_0 = arith.constant 0 : i32
    %c0_i32_1 = arith.constant 0 : i32
    return %c0_i32, %c0_i32_0 : i32, i32
  }
  func.func @transform_5(%arg0: i32) -> (i32, i32) {
    %c0_i32 = arith.constant 0 : i32
    %c0_i32_0 = arith.constant 0 : i32
    %c0_i32_1 = arith.constant 0 : i32
    return %c0_i32, %c0_i32_0 : i32, i32
  }
  func.func @transform_6(%arg0: i32) -> (i32, i32) {
    %c0_i32 = arith.constant 0 : i32
    %c0_i32_0 = arith.constant 0 : i32
    %c0_i32_1 = arith.constant 0 : i32
    return %c0_i32, %c0_i32_0 : i32, i32
  }
  func.func @transform_7(%arg0: i32) -> (i32, i32) {
    %c0_i32 = arith.constant 0 : i32
    %c0_i32_0 = arith.constant 0 : i32
    %c0_i32_1 = arith.constant 0 : i32
    return %c0_i32, %c0_i32_0 : i32, i32
  }
  func.func @transform_8(%arg0: i32) -> (i32, i32) {
    %c0_i32 = arith.constant 0 : i32
    %c0_i32_0 = arith.constant 0 : i32
    %c0_i32_1 = arith.constant 0 : i32
    return %c0_i32, %c0_i32_0 : i32, i32
  }
  func.func @transform_9(%arg0: i32) -> (i32, i32) {
    %c0_i32 = arith.constant 0 : i32
    %c0_i32_0 = arith.constant 0 : i32
    %c0_i32_1 = arith.constant 0 : i32
    return %c0_i32, %c0_i32_0 : i32, i32
  }
  func.func @transform_10(%arg0: i32) -> (i32, i32) {
    %c0_i32 = arith.constant 0 : i32
    %c0_i32_0 = arith.constant 0 : i32
    return %arg0, %c0_i32 : i32, i32
  }
}

</mosaic_0001>

<bundles_post_ra>
// kernel: tpu_custom_call.1
= control target key start
LH: loop header
LB: loop body
LE: loop exit
PB: predicated region body
PF: predicated region fallthrough
CT: control target
= control target key end

     0   :  { %15 = vsyncpa [#allocation4], 0  ;;  %s2280_s0 = inlined_call_operand.hbm [shape: f32[8,32], index: 0, kind: input, shape index: {}]   ;;  %s2281_s1 = inlined_call_operand.hbm [shape: f32[8,8], index: 1, kind: input, shape index: {}]   ;;  %s2282_s2 = inlined_call_operand.hbm [shape: bf16[128,512], index: 2, kind: input, shape index: {}]   ;;  %s2283_s3 = inlined_call_operand.hbm [shape: f32[1,512], index: 3, kind: input, shape index: {}]   ;;  %s2284_s4 = inlined_call_operand.hbm [shape: bf16[256,256], index: 4, kind: input, shape index: {}]   ;;  %s2285_s5 = inlined_call_operand.hbm [shape: bf16[256,256], index: 5, kind: input, shape index: {}]   ;;  %s2286_s6 = inlined_call_operand.vmem [shape: f32[1,512], index: 6, kind: input, shape index: {}]   ;;  %s2287_s7 = inlined_call_operand.hbm [shape: bf16[256,128], index: 7, kind: input, shape index: {}]   ;;  %s2288_s8 = inlined_call_operand.hbm [shape: bf16[256,128], index: 8, kind: input, shape index: {}]   ;;  %s2289_s9 = inlined_call_operand.vmem [shape: f32[1,128], index: 9, kind: input, shape index: {}]   ;;  %s2290_s10 = inlined_call_operand.hbm [shape: bf16[8,128], index: 10, kind: output, shape index: {}]  }
   0x1   :  { %16 = vsyncpa [#allocation7], 0 }
   0x2   :  { %17 = vsyncpa [#allocation10], 0 }
   0x3   :  { %18 = vsyncpa [#allocation13], 0 }
   0x4   :  { %19 = vsyncpa [#allocation16], 0  ;;  %s37_s15 = sshll.u32 %s2281_s1, 4  ;;  %s38_s15 = int_to_ptr.hbm [resolvable:$true] %s37_s15 }
   0x5   :  { %20 = vsyncpa [#allocation5], 0  ;;  %s2172_s16 = smov [#allocation6]   ;;  %s61_s20 = sshll.u32 %s2283_s3, 4  ;;  %s62_s20 = int_to_ptr.hbm [resolvable:$true] %s61_s20 }
   0x6   :  { %s39_s17 = sshll.u32 %s2172_s16, 4  ;;  %s2173_s21 = smov [#allocation9]   ;;  %s40_s17 = int_to_ptr.vmem [resolvable:$true] %s39_s17 }
   0x7   :  { %42 = dma.hbm_to_vmem [thread:$0]  %s38_s15, 128, %s40_s17, [#allocation7]  }
   0x8   :  { %s63_s22 = sshll.u32 %s2173_s21, 4  ;;  %s84_s25 = sshll.u32 %s2285_s5, 4  ;;  %s64_s22 = int_to_ptr.vmem [resolvable:$true] %s63_s22  ;;  %s85_s25 = int_to_ptr.hbm [resolvable:$true] %s84_s25 }
   0x9   :  { %66 = dma.hbm_to_vmem [thread:$0]  %s62_s20, 64, %s64_s22, [#allocation10]  }
   0xa   :  { %s2174_s1 = smov [#allocation12]   ;;  %s26_s29 = sshll.u32 %s2280_s0, 4  ;;  %s27_s29 = int_to_ptr.hbm [resolvable:$true] %s26_s29 }
   0xb   :  { %s86_s26 = sshll.u32 %s2174_s1, 4  ;;  %s2175_s30 = smov 128   ;;  %s87_s26 = int_to_ptr.vmem [resolvable:$true] %s86_s26 }
   0xc   :  { %s2176_s3 = smov 8   ;;  %s2177_s11 = smov [#allocation3]  }
   0xd   :  { %92 = dma.hbm_to_vmem [thread:$0]  %s85_s25, 4096, %s87_s26, [#allocation13], %s2175_s30, %s2175_s30, %s2176_s3  }
   0xe   :  { %s28_s12 = sshll.u32 %s2177_s11, 4  ;;  %s47_s15 = sshll.u32 %s2282_s2, 4  ;;  %s29_s12 = int_to_ptr.vmem [resolvable:$true] %s28_s12  ;;  %s48_s15 = int_to_ptr.hbm [resolvable:$true] %s47_s15 }
   0xf   :  { %31 = dma.hbm_to_vmem [thread:$0]  %s27_s29, 128, %s29_s12, [#allocation4]  }
  0x10   :  { %s2178_s5 = smov [#allocation8]   ;;  %s71_s0 = sshll.u32 %s2284_s4, 4  ;;  %s72_s0 = int_to_ptr.hbm [resolvable:$true] %s71_s0 }
  0x11   :  { %s49_s16 = sshll.u32 %s2178_s5, 4  ;;  %s2179_s19 = smov 256   ;;  %s50_s16 = int_to_ptr.vmem [resolvable:$true] %s49_s16 }
  0x12   :  { %s2180_s20 = smov 16   ;;  %s2181_s21 = smov [#allocation11]  }
  0x13   :  { %55 = dma.hbm_to_vmem [thread:$0]  %s48_s15, 4096, %s50_s16, [#allocation7], %s2179_s19, %s2179_s19, %s2180_s20  }
  0x14   :  { %s73_s22 = sshll.u32 %s2181_s21, 4  ;;  %s99_s2 = sshll.u32 %s2287_s7, 4  ;;  %s74_s22 = int_to_ptr.vmem [resolvable:$true] %s73_s22  ;;  %s100_s2 = int_to_ptr.hbm [resolvable:$true] %s99_s2 }
  0x15   :  { %79 = dma.hbm_to_vmem [thread:$0]  %s72_s0, 4096, %s74_s22, [#allocation10], %s2175_s30, %s2175_s30, %s2176_s3  }
  0x16   :  { %s2182_s25 = smov [#allocation14]   ;;  %s112_s4 = sshll.u32 %s2288_s8, 4  ;;  %s113_s4 = int_to_ptr.hbm [resolvable:$true] %s112_s4 }
  0x17   :  { %s101_s1 = sshll.u32 %s2182_s25, 4  ;;  %s2183_s28 = smov 64   ;;  %s102_s1 = int_to_ptr.vmem [resolvable:$true] %s101_s1 }
  0x18   :  { %s2184_s29 = smov 4   ;;  %s2185_s11 = smov [#allocation15]  }
  0x19   :  { %107 = dma.hbm_to_vmem [thread:$0]  %s100_s2, 2048, %s102_s1, [#allocation13], %s2183_s28, %s2183_s28, %s2184_s29  }
  0x1a   :  { %s114_s12 = sshll.u32 %s2185_s11, 4  ;;  %s115_s12 = int_to_ptr.vmem [resolvable:$true] %s114_s12 }
  0x1b   :  { %120 = dma.hbm_to_vmem [thread:$0]  %s113_s4, 2048, %s115_s12, [#allocation16], %s2183_s28, %s2183_s28, %s2184_s29  }
  0x1c   :  { %2160 = dma.done.wait [#allocation4], 128  }
  0x1d   :  { %2161 = vsyncadd [#allocation4], 4294967168 }
  0x1e   :  { %2162 = dma.done.wait [#allocation7], 4224  }
  0x1f   :  { %2163 = vsyncadd [#allocation7], 4294963072 }
  0x20   :  { %2164 = dma.done.wait [#allocation10], 4160  }
  0x21   :  { %2165 = vsyncadd [#allocation10], 4294963136 }
  0x22   :  { %2166 = dma.done.wait [#allocation13], 6144  }
  0x23   :  { %2167 = vsyncadd [#allocation13], 4294961152 }
  0x24   :  { %2168 = dma.done.wait [#allocation16], 2048  }
  0x25   :  { %2169 = vsyncadd [#allocation16], 4294965248  ;;  %v2186_v0 = vmov 0.0   ;;  %v159_v1 = vld [vmem:[#allocation6] sm:$0xff]  ;;  %v1400_v2 = vld [vmem:[#allocation8 + $0xe0] sm:$0xf] }
  0x26   :  { %155 = vst [vmem:[#allocation2] sm:$0xff] %v2186_v0  ;;  %v1828_v3 = vld [vmem:[#allocation8 + $0xec] sm:$0xf0]  ;;  %s2187_s7 = smov 32   ;;  %v1826_v5 = vld [vmem:[#allocation8 + $0xe4] sm:$0xf] }
  0x27   :  { %161 = vrot.lane.b32.xlu0 %v159_v1, %s2187_s7  ;;  %v1401_v4 = vor.u32 %v1828_v3, %v1400_v2  ;;  %v1402_v6 = vld [vmem:[#allocation8 + $0xf0] sm:$0xf0]  ;;  %v1408_v7 = vld [vmem:[#allocation8 + $0xe8] sm:$0xf]  ;;  %v1829_v9 = vld [vmem:[#allocation8 + $0xf4] sm:$0xf0] }
  0x28   :  { %v1405_v8 = vor.u32 %v1826_v5, %v1402_v6  ;;  %v1827_v10 = vld [vmem:[#allocation8 + $0xec] sm:$0xf]  ;;  %v1410_v11 = vld [vmem:[#allocation8 + $0xf8] sm:$0xf0]  ;;  %v1409_v12 = vor.u32 %v1829_v9, %v1408_v7  ;;  %v1384_v14 = vld [vmem:[#allocation8 + $0xc0] sm:$0xf] }
  0x29   :  { %370 = vmatpush.bf16.msra.mxu0 %v1401_v4  ;;  %v1413_v13 = vor.u32 %v1827_v10, %v1410_v11  ;;  %v1824_v15 = vld [vmem:[#allocation8 + $0xcc] sm:$0xf0]  ;;  %v1822_v16 = vld [vmem:[#allocation8 + $0xc4] sm:$0xf]  ;;  %v1386_v18 = vld [vmem:[#allocation8 + $0xd0] sm:$0xf0] }
  0x2a   :  { %383 = vmatpush.bf16.msra.mxu1 %v1405_v8  ;;  %v1385_v17 = vor.u32 %v1824_v15, %v1384_v14  ;;  %v1392_v19 = vld [vmem:[#allocation8 + $0xc8] sm:$0xf]  ;;  %v1825_v20 = vld [vmem:[#allocation8 + $0xd4] sm:$0xf0]  ;;  %396 = vmatpush.bf16.msra.mxu2 %v1409_v12  ;;  %v1389_v21 = vor.u32 %v1822_v16, %v1386_v18  ;;  %v1823_v23 = vld [vmem:[#allocation8 + $0xcc] sm:$0xf] }
  0x2b   :  { %409 = vmatpush.bf16.msra.mxu3 %v1413_v13  ;;  %v1393_v22 = vor.u32 %v1825_v20, %v1392_v19  ;;  %v1394_v24 = vld [vmem:[#allocation8 + $0xd8] sm:$0xf0]  ;;  %v1368_v25 = vld [vmem:[#allocation8 + $0xa0] sm:$0xf]  ;;  %v1820_v27 = vld [vmem:[#allocation8 + $0xac] sm:$0xf0] }
  0x2c   :  { %v1397_v26 = vor.u32 %v1823_v23, %v1394_v24  ;;  %v1818_v28 = vld [vmem:[#allocation8 + $0xa4] sm:$0xf]  ;;  %v1370_v29 = vld [vmem:[#allocation8 + $0xb0] sm:$0xf0]  ;;  %v1369_v30 = vor.u32 %v1820_v27, %v1368_v25  ;;  %v1376_v31 = vld [vmem:[#allocation8 + $0xa8] sm:$0xf] }
  0x2d   :  { %371 = vmatpush.bf16.msra.mxu0 %v1385_v17  ;;  %v1821_v32 = vld [vmem:[#allocation8 + $0xb4] sm:$0xf0]  ;;  %v1819_v33 = vld [vmem:[#allocation8 + $0xac] sm:$0xf]  ;;  %v1373_v34 = vor.u32 %v1818_v28, %v1370_v29  ;;  %v1378_v35 = vld [vmem:[#allocation8 + $0xb8] sm:$0xf0] }
  0x2e   :  { %384 = vmatpush.bf16.msra.mxu1 %v1389_v21  ;;  %v1352_v36 = vld [vmem:[#allocation8 + $0x80] sm:$0xf]  ;;  %v1816_v37 = vld [vmem:[#allocation8 + $0x8c] sm:$0xf0]  ;;  %397 = vmatpush.bf16.msra.mxu2 %v1393_v22  ;;  %v1377_v38 = vor.u32 %v1821_v32, %v1376_v31  ;;  %v1381_v39 = vor.u32 %v1819_v33, %v1378_v35  ;;  %v1814_v40 = vld [vmem:[#allocation8 + $0x84] sm:$0xf] }
  0x2f   :  { %410 = vmatpush.bf16.msra.mxu3 %v1397_v26  ;;  %v1354_v41 = vld [vmem:[#allocation8 + $0x90] sm:$0xf0]  ;;  %v1360_v42 = vld [vmem:[#allocation8 + $0x88] sm:$0xf]  ;;  %v1817_v43 = vld [vmem:[#allocation8 + $0x94] sm:$0xf0]  ;;  %v1353_v46 = vor.u32 %v1816_v37, %v1352_v36 }
  0x30   :  { %v1815_v44 = vld [vmem:[#allocation8 + $0x8c] sm:$0xf]  ;;  %v1362_v45 = vld [vmem:[#allocation8 + $0x98] sm:$0xf0]  ;;  %v1336_v47 = vld [vmem:[#allocation8 + $0x60] sm:$0xf]  ;;  %v1357_v49 = vor.u32 %v1814_v40, %v1354_v41  ;;  %v1361_v53 = vor.u32 %v1817_v43, %v1360_v42 }
  0x31   :  { %372 = vmatpush.bf16.msra.mxu0 %v1369_v30  ;;  %v1812_v48 = vld [vmem:[#allocation8 + $0x6c] sm:$0xf0]  ;;  %vm157_vm0 = vcmask 261120   ;;  %v1810_v50 = vld [vmem:[#allocation8 + $0x64] sm:$0xf]  ;;  %v1365_v54 = vor.u32 %v1815_v44, %v1362_v45  ;;  %vm164_vm1 = vcmask 326912  }
  0x32   :  { %385 = vmatpush.bf16.msra.mxu1 %v1373_v34  ;;  %v1338_v51 = vld [vmem:[#allocation8 + $0x70] sm:$0xf0]  ;;  %v1344_v52 = vld [vmem:[#allocation8 + $0x68] sm:$0xf]  ;;  %398 = vmatpush.bf16.msra.mxu2 %v1377_v38  ;;  %v1813_v55 = vld [vmem:[#allocation8 + $0x74] sm:$0xf0]  ;;  %v1337_v59 = vor.u32 %v1812_v48, %v1336_v47 }
  0x33   :  { %411 = vmatpush.bf16.msra.mxu3 %v1381_v39  ;;  %v1811_v56 = vld [vmem:[#allocation8 + $0x6c] sm:$0xf]  ;;  %v156_v57 = vld [vmem:[#allocation3] sm:$0xff]  ;;  %v1346_v58 = vld [vmem:[#allocation8 + $0x78] sm:$0xf0]  ;;  %v1341_v60 = vor.u32 %v1810_v50, %v1338_v51  ;;  %v1345_v61 = vor.u32 %v1813_v55, %v1344_v52  ;;  %s2188_s15 = smov [#allocation17]  }
  0x34   :  { %158 = vst.msk [vmem:[#allocation2] sm:$0xff] %vm157_vm0, %v156_v57  ;;  %v1349_v62 = vor.u32 %v1811_v56, %v1346_v58  ;;  %v1320_v63 = vld [vmem:[#allocation8 + $0x40] sm:$0xf]  ;;  %v1808_v0 = vld [vmem:[#allocation8 + $0x4c] sm:$0xf0]  ;;  %s1270_s5 = sshll.u32 %s2188_s15, 4  ;;  %s1271_s5 = int_to_ptr.vmem [resolvable:$true] %s1270_s5 }
  0x35   :  { %373 = vmatpush.bf16.msra.mxu0 %v1353_v46  ;;  %v1806_v1 = vld [vmem:[#allocation8 + $0x44] sm:$0xf]  ;;  %v1321_v2 = vor.u32 %v1808_v0, %v1320_v63  ;;  %v1322_v3 = vld [vmem:[#allocation8 + $0x50] sm:$0xf0]  ;;  %v1328_v4 = vld [vmem:[#allocation8 + $0x48] sm:$0xf] }
  0x36   :  { %386 = vmatpush.bf16.msra.mxu1 %v1357_v49  ;;  %399 = vmatpush.bf16.msra.mxu2 %v1361_v53  ;;  %v1809_v5 = vld [vmem:[#allocation8 + $0x54] sm:$0xf0]  ;;  %v1325_v6 = vor.u32 %v1806_v1, %v1322_v3  ;;  %v1807_v8 = vld [vmem:[#allocation8 + $0x4c] sm:$0xf]  ;;  %v1330_v9 = vld [vmem:[#allocation8 + $0x58] sm:$0xf0] }
  0x37   :  { %412 = vmatpush.bf16.msra.mxu3 %v1365_v54  ;;  %v1329_v7 = vor.u32 %v1809_v5, %v1328_v4  ;;  %v1333_v10 = vor.u32 %v1807_v8, %v1330_v9  ;;  %v1304_v11 = vld [vmem:[#allocation8 + $0x20] sm:$0xf]  ;;  %v1804_v12 = vld [vmem:[#allocation8 + $0x2c] sm:$0xf0]  ;;  %v1802_v13 = vld [vmem:[#allocation8 + $0x24] sm:$0xf] }
  0x38   :  { %v1305_v14 = vor.u32 %v1804_v12, %v1304_v11  ;;  %v1306_v15 = vld [vmem:[#allocation8 + $0x30] sm:$0xf0]  ;;  %v1312_v16 = vld [vmem:[#allocation8 + $0x28] sm:$0xf]  ;;  %v1805_v17 = vld [vmem:[#allocation8 + $0x34] sm:$0xf0] }
  0x39   :  { %374 = vmatpush.bf16.msra.mxu0 %v1337_v59  ;;  %v1309_v18 = vor.u32 %v1802_v13, %v1306_v15  ;;  %v1313_v19 = vor.u32 %v1805_v17, %v1312_v16  ;;  %v1803_v20 = vld [vmem:[#allocation8 + $0x2c] sm:$0xf]  ;;  %v1314_v21 = vld [vmem:[#allocation8 + $0x38] sm:$0xf0]  ;;  %v1288_v22 = vld [vmem:[#allocation8] sm:$0xf] }
  0x3a   :  { %387 = vmatpush.bf16.msra.mxu1 %v1341_v60  ;;  %400 = vmatpush.bf16.msra.mxu2 %v1345_v61  ;;  %v1317_v23 = vor.u32 %v1803_v20, %v1314_v21  ;;  %v1800_v24 = vld [vmem:[#allocation8 + $0xc] sm:$0xf0]  ;;  %v1798_v25 = vld [vmem:[#allocation8 + $0x4] sm:$0xf]  ;;  %v1290_v26 = vld [vmem:[#allocation8 + $0x10] sm:$0xf0] }
  0x3b   :  { %413 = vmatpush.bf16.msra.mxu3 %v1349_v62  ;;  %v1289_v27 = vor.u32 %v1800_v24, %v1288_v22  ;;  %v1293_v28 = vor.u32 %v1798_v25, %v1290_v26  ;;  %v1296_v29 = vld [vmem:[#allocation8 + $0x8] sm:$0xf]  ;;  %v1801_v30 = vld [vmem:[#allocation8 + $0x14] sm:$0xf0]  ;;  %v1799_v31 = vld [vmem:[#allocation8 + $0xc] sm:$0xf] }
  0x3c   :  { %v1297_v32 = vor.u32 %v1801_v30, %v1296_v29  ;;  %v1298_v33 = vld [vmem:[#allocation8 + $0x18] sm:$0xf0]  ;;  %v1472_v35 = vld [vmem:[#allocation11 + $0x70] sm:$0xf]  ;;  %v1844_v40 = vld [vmem:[#allocation11 + $0x74] sm:$0xf] }
  0x3d   :  { %375 = vmatpush.bf16.msra.mxu0 %v1321_v2  ;;  %v1301_v34 = vor.u32 %v1799_v31, %v1298_v33  ;;  %v1845_v36 = vld [vmem:[#allocation11 + $0x74] sm:$0xf0]  ;;  %v1536_v37 = vld [vmem:[#allocation11 + $0xf0] sm:$0xf]  ;;  %v1474_v41 = vld [vmem:[#allocation11 + $0x78] sm:$0xf0] }
  0x3e   :  { %388 = vmatpush.bf16.msra.mxu1 %v1325_v6  ;;  %401 = vmatpush.bf16.msra.mxu2 %v1329_v7  ;;  %v1473_v38 = vor.u32 %v1845_v36, %v1472_v35  ;;  %v1861_v39 = vld [vmem:[#allocation11 + $0xf4] sm:$0xf0]  ;;  %v1477_v43 = vor.u32 %v1844_v40, %v1474_v41  ;;  %v1860_v44 = vld [vmem:[#allocation11 + $0xf4] sm:$0xf]  ;;  %v1538_v45 = vld [vmem:[#allocation11 + $0xf8] sm:$0xf0] }
  0x3f   :  { %414 = vmatpush.bf16.msra.mxu3 %v1333_v10  ;;  %v1537_v42 = vor.u32 %v1861_v39, %v1536_v37  ;;  %v1464_v46 = vld [vmem:[#allocation11 + $0x60] sm:$0xf]  ;;  %v1541_v47 = vor.u32 %v1860_v44, %v1538_v45  ;;  %v1843_v48 = vld [vmem:[#allocation11 + $0x64] sm:$0xf0]  ;;  %v1842_v53 = vld [vmem:[#allocation11 + $0x64] sm:$0xf] }
  0x40   :  { %v1528_v49 = vld [vmem:[#allocation11 + $0xe0] sm:$0xf]  ;;  %v1859_v50 = vld [vmem:[#allocation11 + $0xe4] sm:$0xf0]  ;;  %v1465_v51 = vor.u32 %v1843_v48, %v1464_v46  ;;  %v1466_v54 = vld [vmem:[#allocation11 + $0x68] sm:$0xf0] }
  0x41   :  { %376 = vmatpush.bf16.msra.mxu0 %v1305_v14  ;;  %v1529_v52 = vor.u32 %v1859_v50, %v1528_v49  ;;  %v1858_v55 = vld [vmem:[#allocation11 + $0xe4] sm:$0xf]  ;;  %v1469_v56 = vor.u32 %v1842_v53, %v1466_v54  ;;  %v1530_v57 = vld [vmem:[#allocation11 + $0xe8] sm:$0xf0]  ;;  %v1456_v58 = vld [vmem:[#allocation11 + $0x50] sm:$0xf] }
  0x42   :  { %389 = vmatpush.bf16.msra.mxu1 %v1309_v18  ;;  %402 = vmatpush.bf16.msra.mxu2 %v1313_v19  ;;  %v1841_v59 = vld [vmem:[#allocation11 + $0x54] sm:$0xf0]  ;;  %v1533_v60 = vor.u32 %v1858_v55, %v1530_v57  ;;  %v1520_v61 = vld [vmem:[#allocation11 + $0xd0] sm:$0xf]  ;;  %v1840_v63 = vld [vmem:[#allocation11 + $0x54] sm:$0xf] }
  0x43   :  { %415 = vmatpush.bf16.msra.mxu3 %v1317_v23  ;;  %v1857_v62 = vld [vmem:[#allocation11 + $0xd4] sm:$0xf0]  ;;  %v1457_v0 = vor.u32 %v1841_v59, %v1456_v58  ;;  %v1458_v1 = vld [vmem:[#allocation11 + $0x58] sm:$0xf0]  ;;  %v1856_v2 = vld [vmem:[#allocation11 + $0xd4] sm:$0xf] }
  0x44   :  { %v1522_v3 = vld [vmem:[#allocation11 + $0xd8] sm:$0xf0]  ;;  %v1521_v4 = vor.u32 %v1857_v62, %v1520_v61  ;;  %v1461_v5 = vor.u32 %v1840_v63, %v1458_v1  ;;  %v1448_v6 = vld [vmem:[#allocation11 + $0x40] sm:$0xf]  ;;  %v1839_v7 = vld [vmem:[#allocation11 + $0x44] sm:$0xf0] }
  0x45   :  { %377 = vmatpush.bf16.msra.mxu0 %v1289_v27  ;;  %v1512_v8 = vld [vmem:[#allocation11 + $0xc0] sm:$0xf]  ;;  %v1525_v9 = vor.u32 %v1856_v2, %v1522_v3  ;;  %v1855_v10 = vld [vmem:[#allocation11 + $0xc4] sm:$0xf0]  ;;  %v1838_v11 = vld [vmem:[#allocation11 + $0x44] sm:$0xf]  ;;  %v1449_v15 = vor.u32 %v1839_v7, %v1448_v6 }
  0x46   :  { %390 = vmatpush.bf16.msra.mxu1 %v1293_v28  ;;  %403 = vmatpush.bf16.msra.mxu2 %v1297_v32  ;;  %v1450_v12 = vld [vmem:[#allocation11 + $0x48] sm:$0xf0]  ;;  %v1854_v13 = vld [vmem:[#allocation11 + $0xc4] sm:$0xf]  ;;  %v1513_v16 = vor.u32 %v1855_v10, %v1512_v8  ;;  %v1440_v18 = vld [vmem:[#allocation11 + $0x30] sm:$0xf] }
  0x47   :  { %416 = vmatpush.bf16.msra.mxu3 %v1301_v34  ;;  %v1514_v14 = vld [vmem:[#allocation11 + $0xc8] sm:$0xf0]  ;;  %v1453_v17 = vor.u32 %v1838_v11, %v1450_v12  ;;  %v1837_v19 = vld [vmem:[#allocation11 + $0x34] sm:$0xf0]  ;;  %v1504_v20 = vld [vmem:[#allocation11 + $0xb0] sm:$0xf] }
  0x48   :  { %v1517_v21 = vor.u32 %v1854_v13, %v1514_v14  ;;  %v1853_v22 = vld [vmem:[#allocation11 + $0xb4] sm:$0xf0]  ;;  %v1836_v23 = vld [vmem:[#allocation11 + $0x34] sm:$0xf]  ;;  %v1442_v24 = vld [vmem:[#allocation11 + $0x38] sm:$0xf0]  ;;  %v1441_v27 = vor.u32 %v1837_v19, %v1440_v18 }
  0x49   :  { %633 = vmatpush.bf16.msrb.mxu0 %v1473_v38  ;;  %v1852_v25 = vld [vmem:[#allocation11 + $0xb4] sm:$0xf]  ;;  %v1506_v26 = vld [vmem:[#allocation11 + $0xb8] sm:$0xf0]  ;;  %v1505_v28 = vor.u32 %v1853_v22, %v1504_v20  ;;  %v1445_v29 = vor.u32 %v1836_v23, %v1442_v24  ;;  %v1432_v30 = vld [vmem:[#allocation11 + $0x20] sm:$0xf] }
  0x4a   :  { %646 = vmatpush.bf16.msrb.mxu1 %v1537_v42  ;;  %659 = vmatpush.bf16.msrb.mxu2 %v1477_v43  ;;  %v1835_v31 = vld [vmem:[#allocation11 + $0x24] sm:$0xf0]  ;;  %v1496_v32 = vld [vmem:[#allocation11 + $0xa0] sm:$0xf]  ;;  %v1509_v33 = vor.u32 %v1852_v25, %v1506_v26  ;;  %v1834_v35 = vld [vmem:[#allocation11 + $0x24] sm:$0xf] }
  0x4b   :  { %672 = vmatpush.bf16.msrb.mxu3 %v1541_v47  ;;  %v1851_v34 = vld [vmem:[#allocation11 + $0xa4] sm:$0xf0]  ;;  %v1434_v36 = vld [vmem:[#allocation11 + $0x28] sm:$0xf0]  ;;  %v1850_v37 = vld [vmem:[#allocation11 + $0xa4] sm:$0xf]  ;;  %v1433_v39 = vor.u32 %v1835_v31, %v1432_v30 }
  0x4c   :  { %v1498_v38 = vld [vmem:[#allocation11 + $0xa8] sm:$0xf0]  ;;  %v1424_v40 = vld [vmem:[#allocation11 + $0x10] sm:$0xf]  ;;  %v1497_v42 = vor.u32 %v1851_v34, %v1496_v32  ;;  %v1437_v43 = vor.u32 %v1834_v35, %v1434_v36  ;;  %v1833_v44 = vld [vmem:[#allocation11 + $0x14] sm:$0xf0] }
  0x4d   :  { %634 = vmatpush.bf16.msrb.mxu0 %v1465_v51  ;;  %v1488_v45 = vld [vmem:[#allocation11 + $0x90] sm:$0xf]  ;;  %v1849_v46 = vld [vmem:[#allocation11 + $0x94] sm:$0xf0]  ;;  %v1501_v47 = vor.u32 %v1850_v37, %v1498_v38  ;;  %v1832_v48 = vld [vmem:[#allocation11 + $0x14] sm:$0xf] }
  0x4e   :  { %647 = vmatpush.bf16.msrb.mxu1 %v1529_v52  ;;  %660 = vmatpush.bf16.msrb.mxu2 %v1469_v56  ;;  %v1426_v49 = vld [vmem:[#allocation11 + $0x18] sm:$0xf0]  ;;  %v1848_v50 = vld [vmem:[#allocation11 + $0x94] sm:$0xf]  ;;  %v1425_v52 = vor.u32 %v1833_v44, %v1424_v40  ;;  %v1489_v53 = vor.u32 %v1849_v46, %v1488_v45  ;;  %v1416_v55 = vld [vmem:[#allocation11] sm:$0xf] }
  0x4f   :  { %673 = vmatpush.bf16.msrb.mxu3 %v1533_v60  ;;  %v1490_v51 = vld [vmem:[#allocation11 + $0x98] sm:$0xf0]  ;;  %v1429_v54 = vor.u32 %v1832_v48, %v1426_v49  ;;  %v1831_v56 = vld [vmem:[#allocation11 + $0x4] sm:$0xf0]  ;;  %v1480_v58 = vld [vmem:[#allocation11 + $0x80] sm:$0xf] }
  0x50   :  { %v1493_v57 = vor.u32 %v1848_v50, %v1490_v51  ;;  %v1847_v59 = vld [vmem:[#allocation11 + $0x84] sm:$0xf0]  ;;  %v1830_v60 = vld [vmem:[#allocation11 + $0x4] sm:$0xf]  ;;  %v1418_v61 = vld [vmem:[#allocation11 + $0x8] sm:$0xf0]  ;;  %v1417_v7 = vor.u32 %v1831_v56, %v1416_v55 }
  0x51   :  { %635 = vmatpush.bf16.msrb.mxu0 %v1457_v0  ;;  %v1846_v62 = vld [vmem:[#allocation11 + $0x84] sm:$0xf]  ;;  %v1482_v63 = vld [vmem:[#allocation11 + $0x88] sm:$0xf0]  ;;  %v1600_v0 = vld [vmem:[#allocation12 + $0x70] sm:$0xf]  ;;  %v1481_v8 = vor.u32 %v1847_v59, %v1480_v58  ;;  %v1421_v12 = vor.u32 %v1830_v60, %v1418_v61 }
  0x52   :  { %648 = vmatpush.bf16.msrb.mxu1 %v1521_v4  ;;  %661 = vmatpush.bf16.msrb.mxu2 %v1461_v5  ;;  %v1877_v1 = vld [vmem:[#allocation12 + $0x74] sm:$0xf0]  ;;  %v1664_v2 = vld [vmem:[#allocation12 + $0xf0] sm:$0xf]  ;;  %v1876_v5 = vld [vmem:[#allocation12 + $0x74] sm:$0xf]  ;;  %v1485_v13 = vor.u32 %v1846_v62, %v1482_v63 }
  0x53   :  { %674 = vmatpush.bf16.msrb.mxu3 %v1525_v9  ;;  %v1893_v4 = vld [vmem:[#allocation12 + $0xf4] sm:$0xf0]  ;;  %v1602_v9 = vld [vmem:[#allocation12 + $0x78] sm:$0xf0]  ;;  %v1892_v10 = vld [vmem:[#allocation12 + $0xf4] sm:$0xf]  ;;  %v1601_v14 = vor.u32 %v1877_v1, %v1600_v0 }
  0x54   :  { %v1666_v11 = vld [vmem:[#allocation12 + $0xf8] sm:$0xf0]  ;;  %v1592_v18 = vld [vmem:[#allocation12 + $0x60] sm:$0xf]  ;;  %v1875_v19 = vld [vmem:[#allocation12 + $0x64] sm:$0xf0] }
  0x55   :  { %636 = vmatpush.bf16.msrb.mxu0 %v1449_v15  ;;  %v1665_v15 = vor.u32 %v1893_v4, %v1664_v2  ;;  %v1656_v20 = vld [vmem:[#allocation12 + $0xe0] sm:$0xf]  ;;  %v1891_v22 = vld [vmem:[#allocation12 + $0xe4] sm:$0xf0]  ;;  %v1874_v23 = vld [vmem:[#allocation12 + $0x64] sm:$0xf] }
  0x56   :  { %649 = vmatpush.bf16.msrb.mxu1 %v1513_v16  ;;  %662 = vmatpush.bf16.msrb.mxu2 %v1453_v17  ;;  %v1605_v16 = vor.u32 %v1876_v5, %v1602_v9  ;;  %v1669_v17 = vor.u32 %v1892_v10, %v1666_v11  ;;  %v1594_v24 = vld [vmem:[#allocation12 + $0x68] sm:$0xf0]  ;;  %v1657_v25 = vor.u32 %v1891_v22, %v1656_v20  ;;  %v1584_v30 = vld [vmem:[#allocation12 + $0x50] sm:$0xf]  ;;  %v1873_v31 = vld [vmem:[#allocation12 + $0x54] sm:$0xf0] }
  0x57   :  { %675 = vmatpush.bf16.msrb.mxu3 %v1517_v21  ;;  %v1593_v21 = vor.u32 %v1875_v19, %v1592_v18  ;;  %v1597_v26 = vor.u32 %v1874_v23, %v1594_v24  ;;  %v1648_v32 = vld [vmem:[#allocation12 + $0xd0] sm:$0xf]  ;;  %v1889_v34 = vld [vmem:[#allocation12 + $0xd4] sm:$0xf0]  ;;  %v1872_v35 = vld [vmem:[#allocation12 + $0x54] sm:$0xf] }
  0x58   :  { %v1586_v36 = vld [vmem:[#allocation12 + $0x58] sm:$0xf0]  ;;  %v1649_v37 = vor.u32 %v1889_v34, %v1648_v32  ;;  %v1640_v45 = vld [vmem:[#allocation12 + $0xc0] sm:$0xf]  ;;  %v1887_v46 = vld [vmem:[#allocation12 + $0xc4] sm:$0xf0] }
  0x59   :  { %637 = vmatpush.bf16.msrb.mxu0 %v1441_v27  ;;  %v1890_v27 = vld [vmem:[#allocation12 + $0xe4] sm:$0xf]  ;;  %v1589_v38 = vor.u32 %v1872_v35, %v1586_v36  ;;  %v1650_v40 = vld [vmem:[#allocation12 + $0xd8] sm:$0xf0]  ;;  %v1641_v48 = vor.u32 %v1887_v46, %v1640_v45  ;;  %v1578_v49 = vld [vmem:[#allocation12 + $0x48] sm:$0xf0] }
  0x5a   :  { %650 = vmatpush.bf16.msrb.mxu1 %v1505_v28  ;;  %663 = vmatpush.bf16.msrb.mxu2 %v1445_v29  ;;  %v1658_v28 = vld [vmem:[#allocation12 + $0xe8] sm:$0xf0]  ;;  %v1886_v50 = vld [vmem:[#allocation12 + $0xc4] sm:$0xf]  ;;  %v1869_v55 = vld [vmem:[#allocation12 + $0x34] sm:$0xf0] }
  0x5b   :  { %676 = vmatpush.bf16.msrb.mxu3 %v1509_v33  ;;  %v1661_v29 = vor.u32 %v1890_v27, %v1658_v28  ;;  %v1585_v33 = vor.u32 %v1873_v31, %v1584_v30  ;;  %v1642_v51 = vld [vmem:[#allocation12 + $0xc8] sm:$0xf0]  ;;  %v1632_v56 = vld [vmem:[#allocation12 + $0xb0] sm:$0xf]  ;;  %v1885_v58 = vld [vmem:[#allocation12 + $0xb4] sm:$0xf0] }
  0x5c   :  { %v1868_v59 = vld [vmem:[#allocation12 + $0x34] sm:$0xf]  ;;  %v1570_v60 = vld [vmem:[#allocation12 + $0x38] sm:$0xf0]  ;;  %v1633_v61 = vor.u32 %v1885_v58, %v1632_v56  ;;  %v1560_v2 = vld [vmem:[#allocation12 + $0x20] sm:$0xf] }
  0x5d   :  { %638 = vmatpush.bf16.msrb.mxu0 %v1433_v39  ;;  %v1888_v39 = vld [vmem:[#allocation12 + $0xd4] sm:$0xf]  ;;  %v1573_v62 = vor.u32 %v1868_v59, %v1570_v60  ;;  %v1634_v0 = vld [vmem:[#allocation12 + $0xb8] sm:$0xf0]  ;;  %v1624_v4 = vld [vmem:[#allocation12 + $0xa0] sm:$0xf] }
  0x5e   :  { %651 = vmatpush.bf16.msrb.mxu1 %v1497_v42  ;;  %664 = vmatpush.bf16.msrb.mxu2 %v1437_v43  ;;  %v1576_v42 = vld [vmem:[#allocation12 + $0x40] sm:$0xf]  ;;  %v1871_v43 = vld [vmem:[#allocation12 + $0x44] sm:$0xf0]  ;;  %v1884_v63 = vld [vmem:[#allocation12 + $0xb4] sm:$0xf] }
  0x5f   :  { %677 = vmatpush.bf16.msrb.mxu3 %v1501_v47  ;;  %v1577_v44 = vor.u32 %v1871_v43, %v1576_v42  ;;  %v1870_v47 = vld [vmem:[#allocation12 + $0x44] sm:$0xf]  ;;  %v1637_v1 = vor.u32 %v1884_v63, %v1634_v0  ;;  %v1864_v20 = vld [vmem:[#allocation12 + $0x14] sm:$0xf]  ;;  %v1618_v24 = vld [vmem:[#allocation12 + $0x98] sm:$0xf0] }
  0x60   :  { %v1882_v11 = vld [vmem:[#allocation12 + $0xa4] sm:$0xf]  ;;  %v1880_v22 = vld [vmem:[#allocation12 + $0x94] sm:$0xf]  ;;  %v1608_v28 = vld [vmem:[#allocation12 + $0x80] sm:$0xf] }
  0x61   :  { %639 = vmatpush.bf16.msrb.mxu0 %v1425_v52  ;;  %v1581_v52 = vor.u32 %v1870_v47, %v1578_v49  ;;  %v1621_v27 = vor.u32 %v1880_v22, %v1618_v24  ;;  %v1862_v30 = vld [vmem:[#allocation12 + $0x4] sm:$0xf]  ;;  %v1546_v32 = vld [vmem:[#allocation12 + $0x8] sm:$0xf0]  ;;  %v1901_v60 = vld [vmem:[#allocation14 + $0x38] sm:$0xff]  ;;  %s1272_s18 = sshll.u32 %s2290_s10, 4  ;;  %s1273_s18 = int_to_ptr.hbm [resolvable:$true] %s1272_s18 }
  0x62   :  { %652 = vmatpush.bf16.msrb.mxu1 %v1489_v53  ;;  %665 = vmatpush.bf16.msrb.mxu2 %v1429_v54  ;;  %v1645_v53 = vor.u32 %v1886_v50, %v1642_v51  ;;  %v1568_v54 = vld [vmem:[#allocation12 + $0x30] sm:$0xf]  ;;  %v1610_v34 = vld [vmem:[#allocation12 + $0x88] sm:$0xf0]  ;;  %v1549_v36 = vor.u32 %v1862_v30, %v1546_v32  ;;  %v1894_v24 = vld [vmem:[#allocation14] sm:$0xff] }
  0x63   :  { %678 = vmatpush.bf16.msrb.mxu3 %v1493_v57  ;;  %v1569_v57 = vor.u32 %v1869_v55, %v1568_v54  ;;  %v1904_v22 = vld [vmem:[#allocation14 + $0x50] sm:$0xff]  ;;  %v1911_v32 = vld [vmem:[#allocation15 + $0x8] sm:$0xff] }
  0x64   :  { %v1912_v30 = vld [vmem:[#allocation15 + $0x10] sm:$0xff] }
  0x65   :  { %640 = vmatpush.bf16.msrb.mxu0 %v1417_v7  ;;  %v1866_v7 = vld [vmem:[#allocation12 + $0x24] sm:$0xf] }
  0x66   :  { %653 = vmatpush.bf16.msrb.mxu1 %v1481_v8  ;;  %666 = vmatpush.bf16.msrb.mxu2 %v1421_v12  ;;  %v1562_v8 = vld [vmem:[#allocation12 + $0x28] sm:$0xf0] }
  0x67   :  { %679 = vmatpush.bf16.msrb.mxu3 %v1485_v13  ;;  %v1565_v10 = vor.u32 %v1866_v7, %v1562_v8  ;;  %v1626_v12 = vld [vmem:[#allocation12 + $0xa8] sm:$0xf0]  ;;  %v1552_v13 = vld [vmem:[#allocation12 + $0x10] sm:$0xf] }
  0x68   :  { %v1899_v7 = vld [vmem:[#allocation14 + $0x28] sm:$0xff] }
  0x69   :  { %v1907_v8 = vld [vmem:[#allocation14 + $0x68] sm:$0xff] }
  0x99   :  { %v162_v41 = vpop.permute.xlu0 %161 }
  0x9a   :  { %165 = vst.msk [vmem:[#allocation2] sm:$0xff] %vm164_vm1, %v162_v41  ;;  %v1653_v41 = vor.u32 %v1888_v39, %v1650_v40 }
  0xa1   :  { %v166_v3 = vld [vmem:[#allocation2] sm:$0xff] }
  0xa2   :  { %v167_v6 = vpack.c.bf16 %v166_v3, %v166_v3  ;;  %v1867_v3 = vld [vmem:[#allocation12 + $0x24] sm:$0xf0] }
  0xa3   :  { %v1561_v5 = vor.u32 %v1867_v3, %v1560_v2  ;;  %v1908_v2 = vld [vmem:[#allocation14 + $0x70] sm:$0xff] }
  0xa4   :  { %378 = vmatmul.bf16.vlgmr.msra.gmra.mxu0 %v167_v6  ;;  %391 = vmatmul.bf16.vlgmr.msra.gmra.mxu1 %v167_v6  ;;  %v1916_v3 = vld [vmem:[#allocation15 + $0x30] sm:$0xff] }
  0xa5   :  { %404 = vmatmul.bf16.vlgmr.msra.gmra.mxu2 %v167_v6  ;;  %417 = vmatmul.bf16.vlgmr.msra.gmra.mxu3 %v167_v6  ;;  %v1883_v6 = vld [vmem:[#allocation12 + $0xa4] sm:$0xf0] }
  0xa6   :  { %890 = vmatpush.bf16.msra.mxu0 %v1601_v14  ;;  %903 = vmatpush.bf16.msra.mxu1 %v1665_v15  ;;  %v1625_v9 = vor.u32 %v1883_v6, %v1624_v4  ;;  %v1629_v14 = vor.u32 %v1882_v11, %v1626_v12  ;;  %v1865_v15 = vld [vmem:[#allocation12 + $0x14] sm:$0xf0]  ;;  %v1898_v11 = vld [vmem:[#allocation14 + $0x20] sm:$0xff] }
  0xa7   :  { %916 = vmatpush.bf16.msra.mxu2 %v1605_v16  ;;  %929 = vmatpush.bf16.msra.mxu3 %v1669_v17  ;;  %v1616_v16 = vld [vmem:[#allocation12 + $0x90] sm:$0xf]  ;;  %v1881_v17 = vld [vmem:[#allocation12 + $0x94] sm:$0xf0]  ;;  %v1553_v18 = vor.u32 %v1865_v15, %v1552_v13  ;;  %v1906_v12 = vld [vmem:[#allocation14 + $0x60] sm:$0xff] }
  0xa8   :  { %v1617_v19 = vor.u32 %v1881_v17, %v1616_v16  ;;  %v1897_v15 = vld [vmem:[#allocation14 + $0x18] sm:$0xff]  ;;  %v1896_v16 = vld [vmem:[#allocation14 + $0x10] sm:$0xff] }
  0xa9   :  { %v1925_v17 = vld [vmem:[#allocation15 + $0x78] sm:$0xff] }
  0xaa   :  { %891 = vmatpush.bf16.msra.mxu0 %v1593_v21  ;;  %904 = vmatpush.bf16.msra.mxu1 %v1657_v25  ;;  %v1554_v21 = vld [vmem:[#allocation12 + $0x18] sm:$0xf0]  ;;  %v1544_v25 = vld [vmem:[#allocation12] sm:$0xf] }
  0xab   :  { %917 = vmatpush.bf16.msra.mxu2 %v1597_v26  ;;  %930 = vmatpush.bf16.msra.mxu3 %v1661_v29  ;;  %v1557_v23 = vor.u32 %v1864_v20, %v1554_v21  ;;  %v1863_v26 = vld [vmem:[#allocation12 + $0x4] sm:$0xf0]  ;;  %v1924_v21 = vld [vmem:[#allocation15 + $0x70] sm:$0xff] }
  0xac   :  { %v1879_v29 = vld [vmem:[#allocation12 + $0x84] sm:$0xf0]  ;;  %v1545_v31 = vor.u32 %v1863_v26, %v1544_v25 }
  0xad   :  { %v1609_v35 = vor.u32 %v1879_v29, %v1608_v28  ;;  %v1895_v20 = vld [vmem:[#allocation14 + $0x8] sm:$0xff]  ;;  %v1922_v28 = vld [vmem:[#allocation15 + $0x60] sm:$0xff] }
  0xae   :  { %892 = vmatpush.bf16.msra.mxu0 %v1585_v33  ;;  %905 = vmatpush.bf16.msra.mxu1 %v1649_v37  ;;  %v1878_v33 = vld [vmem:[#allocation12 + $0x84] sm:$0xf]  ;;  %v1923_v25 = vld [vmem:[#allocation15 + $0x68] sm:$0xff] }
  0xaf   :  { %918 = vmatpush.bf16.msra.mxu2 %v1589_v38  ;;  %931 = vmatpush.bf16.msra.mxu3 %v1653_v41  ;;  %v1613_v37 = vor.u32 %v1878_v33, %v1610_v34  ;;  %v200_v38 = vld [vmem:[#allocation9] sm:$0xf]  ;;  %v1903_v26 = vld [vmem:[#allocation14 + $0x48] sm:$0xff]  ;;  %v1902_v29 = vld [vmem:[#allocation14 + $0x40] sm:$0xff] }
  0xb0   :  { %v202_v39 = vperm.slane %v200_v38, 0  ;;  %v203_v40 = vperm.slane %v200_v38, 1  ;;  %v205_v49 = vperm.slane %v200_v38, 3  ;;  %v1920_v33 = vld [vmem:[#allocation15 + $0x50] sm:$0xff]  ;;  %v1910_v34 = vld [vmem:[#allocation15] sm:$0xff] }
  0xb2   :  { %893 = vmatpush.bf16.msra.mxu0 %v1577_v44  ;;  %906 = vmatpush.bf16.msra.mxu1 %v1641_v48  ;;  %v204_v48 = vperm.slane %v200_v38, 2 }
  0xb3   :  { %919 = vmatpush.bf16.msra.mxu2 %v1581_v52  ;;  %932 = vmatpush.bf16.msra.mxu3 %v1645_v53 }
  0xb6   :  { %894 = vmatpush.bf16.msra.mxu0 %v1569_v57  ;;  %907 = vmatpush.bf16.msra.mxu1 %v1633_v61  ;;  %v1909_v61 = vld [vmem:[#allocation14 + $0x78] sm:$0xff] }
  0xb7   :  { %920 = vmatpush.bf16.msra.mxu2 %v1573_v62  ;;  %933 = vmatpush.bf16.msra.mxu3 %v1637_v1  ;;  %v1917_v62 = vld [vmem:[#allocation15 + $0x38] sm:$0xff]  ;;  %v1900_v1 = vld [vmem:[#allocation14 + $0x30] sm:$0xff] }
  0xba   :  { %895 = vmatpush.bf16.msra.mxu0 %v1561_v5  ;;  %908 = vmatpush.bf16.msra.mxu1 %v1625_v9 }
  0xbb   :  { %921 = vmatpush.bf16.msra.mxu2 %v1565_v10  ;;  %934 = vmatpush.bf16.msra.mxu3 %v1629_v14 }
  0xbe   :  { %896 = vmatpush.bf16.msra.mxu0 %v1553_v18  ;;  %909 = vmatpush.bf16.msra.mxu1 %v1617_v19  ;;  %v1905_v18 = vld [vmem:[#allocation14 + $0x58] sm:$0xff]  ;;  %v1915_v19 = vld [vmem:[#allocation15 + $0x28] sm:$0xff] }
  0xbf   :  { %922 = vmatpush.bf16.msra.mxu2 %v1557_v23  ;;  %935 = vmatpush.bf16.msra.mxu3 %v1621_v27  ;;  %v1914_v23 = vld [vmem:[#allocation15 + $0x20] sm:$0xff]  ;;  %v1913_v27 = vld [vmem:[#allocation15 + $0x18] sm:$0xff] }
  0xc2   :  { %897 = vmatpush.bf16.msra.mxu0 %v1545_v31  ;;  %910 = vmatpush.bf16.msra.mxu1 %v1609_v35  ;;  %v1921_v31 = vld [vmem:[#allocation15 + $0x58] sm:$0xff]  ;;  %v1919_v35 = vld [vmem:[#allocation15 + $0x48] sm:$0xff] }
  0xc3   :  { %923 = vmatpush.bf16.msra.mxu2 %v1549_v36  ;;  %936 = vmatpush.bf16.msra.mxu3 %v1613_v37  ;;  %v460_v36 = vld [vmem:[%s2286_s6] sm:$0x3] }
  0xc4   :  { %v1918_v37 = vld [vmem:[#allocation15 + $0x40] sm:$0xff]  ;;  %v462_v38 = vperm.slane %v460_v36, 0 }
 0x121   :  { %v379_v41 = vpop.f32.mrf.mxu0  ;;  %v392_v42 = vpop.f32.mrf.mxu1 }
 0x122   :  { %v380_v43 = vadd.f32 %v379_v41, %v202_v39  ;;  %v393_v44 = vadd.f32 %v392_v42, %v203_v40 }
 0x124   :  { %v422_v45 = vmax.f32 %v380_v43, 0.0  ;;  %v423_v46 = vmax.f32 %v393_v44, 0.0  ;;  %v463_v43 = vperm.slane %v460_v36, 1 }
 0x126   :  { %v426_v47 = vpack.c.bf16 %v423_v46, %v422_v45 }
 0x128   :  { %v405_v50 = vpop.f32.mrf.mxu2  ;;  %v418_v51 = vpop.f32.mrf.mxu3  ;;  %v467_v52 = vunpack.c.l.b16 %v426_v47  ;;  %v468_v53 = vunpack.c.h.b16 %v426_v47 }
 0x129   :  { %v381_v54 = vpop.f32.mrf.mxu0  ;;  %v394_v55 = vpop.f32.mrf.mxu1  ;;  %v406_v56 = vadd.f32 %v405_v50, %v204_v48  ;;  %v419_v57 = vadd.f32 %v418_v51, %v205_v49 }
 0x12a   :  { %v469_v58 = vpack.c.b16 %v467_v52, %v467_v52  ;;  %v470_v59 = vpack.c.b16 %v468_v53, %v468_v53  ;;  %v717_v52 = vld [vmem:[%s2286_s6 + $0x2] sm:$0x3] }
 0x12b   :  { %v424_v63 = vmax.f32 %v406_v56, 0.0  ;;  %v425_v0 = vmax.f32 %v419_v57, 0.0  ;;  %v719_v54 = vperm.slane %v717_v52, 0 }
 0x12c   :  { %641 = vmatmul.bf16.vlgmr.msrb.gmra.mxu0 %v469_v58  ;;  %654 = vmatmul.bf16.vlgmr.msrb.gmra.mxu1 %v470_v59 }
 0x12d   :  { %667 = vmatmul.bf16.vlgmr.msrb.gmra.mxu2 %v469_v58  ;;  %680 = vmatmul.bf16.vlgmr.msrb.gmra.mxu3 %v470_v59  ;;  %v427_v6 = vpack.c.bf16 %v425_v0, %v424_v63 }
 0x12e   :  { %1232 = vmatpush.bf16.msrb.mxu2 %v1901_v60  ;;  %1245 = vmatpush.bf16.msrb.mxu3 %v1909_v61 }
 0x12f   :  { %1110 = vmatpush.bf16.msrb.mxu0 %v1917_v62  ;;  %v724_v9 = vunpack.c.l.b16 %v427_v6  ;;  %v725_v10 = vunpack.c.h.b16 %v427_v6  ;;  %1123 = vmatpush.bf16.msrb.mxu1 %v1925_v17  ;;  %v720_v62 = vperm.slane %v717_v52, 1 }
 0x130   :  { %v407_v4 = vpop.f32.mrf.mxu2  ;;  %v420_v5 = vpop.f32.mrf.mxu3 }
 0x131   :  { %v726_v13 = vpack.c.b16 %v724_v9, %v724_v9  ;;  %v727_v14 = vpack.c.b16 %v725_v10, %v725_v10 }
 0x132   :  { %1233 = vmatpush.bf16.msrb.mxu2 %v1900_v1  ;;  %1246 = vmatpush.bf16.msrb.mxu3 %v1908_v2 }
 0x133   :  { %1111 = vmatpush.bf16.msrb.mxu0 %v1916_v3  ;;  %1124 = vmatpush.bf16.msrb.mxu1 %v1924_v21 }
 0x136   :  { %1234 = vmatpush.bf16.msrb.mxu2 %v1899_v7  ;;  %1247 = vmatpush.bf16.msrb.mxu3 %v1907_v8 }
 0x137   :  { %1112 = vmatpush.bf16.msrb.mxu0 %v1915_v19  ;;  %1125 = vmatpush.bf16.msrb.mxu1 %v1923_v25 }
 0x13a   :  { %1235 = vmatpush.bf16.msrb.mxu2 %v1898_v11  ;;  %1248 = vmatpush.bf16.msrb.mxu3 %v1906_v12 }
 0x13b   :  { %1113 = vmatpush.bf16.msrb.mxu0 %v1914_v23  ;;  %1126 = vmatpush.bf16.msrb.mxu1 %v1922_v28 }
 0x13c   :  { %898 = vmatmul.bf16.vlgmr.msra.gmra.mxu0 %v726_v13  ;;  %911 = vmatmul.bf16.vlgmr.msra.gmra.mxu1 %v727_v14 }
 0x13d   :  { %924 = vmatmul.bf16.vlgmr.msra.gmra.mxu2 %v726_v13  ;;  %937 = vmatmul.bf16.vlgmr.msra.gmra.mxu3 %v727_v14 }
 0x13e   :  { %1236 = vmatpush.bf16.msrb.mxu2 %v1897_v15  ;;  %1249 = vmatpush.bf16.msrb.mxu3 %v1905_v18 }
 0x13f   :  { %1114 = vmatpush.bf16.msrb.mxu0 %v1913_v27  ;;  %1127 = vmatpush.bf16.msrb.mxu1 %v1921_v31 }
 0x142   :  { %1237 = vmatpush.bf16.msrb.mxu2 %v1896_v16  ;;  %1250 = vmatpush.bf16.msrb.mxu3 %v1904_v22 }
 0x143   :  { %1115 = vmatpush.bf16.msrb.mxu0 %v1912_v30  ;;  %1128 = vmatpush.bf16.msrb.mxu1 %v1920_v33 }
 0x146   :  { %1238 = vmatpush.bf16.msrb.mxu2 %v1895_v20  ;;  %1251 = vmatpush.bf16.msrb.mxu3 %v1903_v26  ;;  %v1943_v20 = vld [vmem:[%s2289_s9] ss:$0 sm:$0xff] }
 0x147   :  { %1116 = vmatpush.bf16.msrb.mxu0 %v1911_v32  ;;  %1129 = vmatpush.bf16.msrb.mxu1 %v1919_v35 }
 0x14a   :  { %1239 = vmatpush.bf16.msrb.mxu2 %v1894_v24  ;;  %1252 = vmatpush.bf16.msrb.mxu3 %v1902_v29 }
 0x14b   :  { %1117 = vmatpush.bf16.msrb.mxu0 %v1910_v34  ;;  %1130 = vmatpush.bf16.msrb.mxu1 %v1918_v37 }
 0x1a9   :  { %v642_v39 = vpop.f32.mrf.mxu0  ;;  %v655_v40 = vpop.f32.mrf.mxu1 }
 0x1aa   :  { %v643_v41 = vadd.f32 %v642_v39, %v462_v38 }
 0x1ac   :  { %v656_v42 = vadd.f32 %v655_v40, %v643_v41 }
 0x1ae   :  { %v942_v44 = vmax.f32 %v656_v42, 0.0 }
 0x1b0   :  { %v944_v45 = vpack.c.bf16 %v942_v44, %v942_v44  ;;  %v668_v46 = vpop.f32.mrf.mxu2  ;;  %v681_v47 = vpop.f32.mrf.mxu3 }
 0x1b1   :  { %v669_v48 = vadd.f32 %v668_v46, %v463_v43  ;;  %v644_v49 = vpop.f32.mrf.mxu0  ;;  %v657_v50 = vpop.f32.mrf.mxu1 }
 0x1b2   :  { %1240 = vmatmul.bf16.vlgmr.msrb.gmra.mxu2 %v944_v45 }
 0x1b3   :  { %v682_v51 = vadd.f32 %v681_v47, %v669_v48 }
 0x1b5   :  { %v943_v53 = vmax.f32 %v682_v51, 0.0 }
 0x1b7   :  { %v945_v55 = vpack.c.bf16 %v943_v53, %v943_v53 }
 0x1b8   :  { %v670_v56 = vpop.f32.mrf.mxu2  ;;  %v683_v57 = vpop.f32.mrf.mxu3 }
 0x1b9   :  { %1253 = vmatmul.bf16.vlgmr.msrb.gmra.mxu3 %v945_v55  ;;  %v899_v58 = vpop.f32.mrf.mxu0  ;;  %v912_v59 = vpop.f32.mrf.mxu1 }
 0x1ba   :  { %v900_v60 = vadd.f32 %v899_v58, %v719_v54 }
 0x1bc   :  { %v913_v61 = vadd.f32 %v912_v59, %v900_v60 }
 0x1be   :  { %v946_v63 = vmax.f32 %v913_v61, 0.0 }
 0x1c0   :  { %v948_v0 = vpack.c.bf16 %v946_v63, %v946_v63  ;;  %v925_v1 = vpop.f32.mrf.mxu2  ;;  %v938_v2 = vpop.f32.mrf.mxu3 }
 0x1c1   :  { %v926_v3 = vadd.f32 %v925_v1, %v720_v62  ;;  %v901_v4 = vpop.f32.mrf.mxu0  ;;  %v914_v5 = vpop.f32.mrf.mxu1 }
 0x1c2   :  { %1118 = vmatmul.bf16.vlgmr.msrb.gmra.mxu0 %v948_v0 }
 0x1c3   :  { %v939_v6 = vadd.f32 %v938_v2, %v926_v3 }
 0x1c5   :  { %v947_v7 = vmax.f32 %v939_v6, 0.0 }
 0x1c7   :  { %v949_v8 = vpack.c.bf16 %v947_v7, %v947_v7 }
 0x1c8   :  { %v927_v9 = vpop.f32.mrf.mxu2  ;;  %v940_v10 = vpop.f32.mrf.mxu3 }
 0x1c9   :  { %1131 = vmatmul.bf16.vlgmr.msrb.gmra.mxu1 %v949_v8 }
 0x235   :  { %v1241_v11 = vpop.f32.mrf.mxu2 }
 0x23c   :  { %v1254_v12 = vpop.f32.mrf.mxu3 }
 0x23d   :  { %v1243_v13 = vpop.f32.mrf.mxu2 }
 0x23f   :  { %v1119_v14 = vpop.f32.mrf.mxu0 }
 0x244   :  { %v1256_v15 = vpop.f32.mrf.mxu3 }
 0x246   :  { %v1132_v16 = vpop.f32.mrf.mxu1 }
 0x247   :  { %v1133_v17 = vadd.f32 %v1132_v16, %v1119_v14  ;;  %v1121_v18 = vpop.f32.mrf.mxu0 }
 0x249   :  { %v1242_v19 = vadd.f32 %v1241_v11, %v1133_v17 }
 0x24b   :  { %v1255_v21 = vadd.f32 %v1254_v12, %v1242_v19 }
 0x24d   :  { %v1262_v22 = vadd.f32 %v1943_v20, %v1255_v21 }
 0x24e   :  { %v1134_v23 = vpop.f32.mrf.mxu1 }
 0x24f   :  { %v1263_v24 = vpack.c.bf16 %v1262_v22, %v1262_v22 }
 0x251   :  { %1264 = vst [vmem:[#allocation17] sm:$0xf] %v1263_v24 }
 0x252   :  { %1275 = dma.vmem_to_hbm [thread:$0]  %s1271_s5, 64, %s1273_s18, [#allocation5]  }
 0x253   :  { %2170 = dma.done.wait [#allocation5], 64  }
 0x254   :  { %2171 = vsyncadd [#allocation5], 4294967232 }
 0x255   :  { %1280 = vsyncpa [#allocation4], 1 }
 0x256   :  { %1281 = vsyncpa [#allocation7], 1 }
 0x257   :  { %1282 = vsyncpa [#allocation10], 1 }
 0x258   :  { %1283 = vsyncpa [#allocation13], 1 }
 0x259   :  { %1284 = vsyncpa [#allocation16], 1 }
 0x25a   :  { %1285 = vsyncpa [#allocation5], 1 }

</bundles_post_ra>
